<compile_context>
chip_gen: v5e
topology: v5e:2x2
jax: 0.10.0
libtpu: 0.0.40
codegen_flags: <defaults>
</compile_context>

<pallas_src>
import jax
import jax.numpy as jnp
from jax.experimental import pallas as pl
from jax.experimental.pallas import tpu as pltpu  # noqa: F401  (kept for parity)

# Logical sizes from the PyTorch module.
B, IN, OUT = 4, 10, 10
# Minimal padded sizes: rows -> sublane multiple (8), contraction -> 16,
# output lanes -> 128 so the single output store is a full unmasked vreg row.
B_PAD, K_PAD, OUT_PAD = 8, 16, 128


def _linear_add_relu_kernel(x_ref, w_ref, bo_ref, o_ref):
    # x_ref: (B_PAD, K_PAD)  w_ref: (K_PAD, OUT_PAD)  bo_ref: (1, OUT_PAD)
    acc = jnp.dot(x_ref[...], w_ref[...], preferred_element_type=jnp.float32)
    o_ref[...] = jnp.maximum(acc + bo_ref[...], 0.0).astype(o_ref.dtype)


# Single invocation, no grid, full-array blocks resident in VMEM.
_fused_call = pl.pallas_call(
    _linear_add_relu_kernel,
    out_shape=jax.ShapeDtypeStruct((B_PAD, OUT_PAD), jnp.float32),
)


def prepare_weight(weight):
    """One-time (init) prep: transpose + zero-pad W to a (K_PAD, OUT_PAD) slab."""
    w_t = jnp.zeros((K_PAD, OUT_PAD), dtype=jnp.float32)
    return w_t.at[:IN, :OUT].set(weight.T.astype(jnp.float32))


@jax.jit
def linear_add_relu(x, w_t_padded, bias, other):
    """relu(x @ weight.T + bias + other) with one Pallas kernel call.

    `w_t_padded` comes from prepare_weight (done once at init).
    bias and other are pre-added (in f32) into a single broadcast operand.
    Zero-padding of the contraction dim contributes nothing to the dot, and
    padded output rows/cols are sliced away, so semantics match nn.Linear.
    """
    xp = jnp.zeros((B_PAD, K_PAD), dtype=jnp.float32).at[:B, :IN].set(
        x.astype(jnp.float32))
    bo = jnp.zeros((1, OUT_PAD), dtype=jnp.float32).at[0, :OUT].set(
        (bias.astype(jnp.float32) + other.astype(jnp.float32)))
    out_padded = _fused_call(xp, w_t_padded, bo)
    return out_padded[:B, :OUT]


if __name__ == "__main__":
    key = jax.random.PRNGKey(0)
    k_x, k_o, k_w, k_b = jax.random.split(key, 4)

    x = jax.random.normal(k_x, (B, IN), dtype=jnp.float32)
    other = jax.random.normal(k_o, (OUT,), dtype=jnp.float32)

    # Deterministic "Linear(10, 10)" parameters (PyTorch-style uniform init,
    # fixed JAX key).
    bound = 1.0 / jnp.sqrt(jnp.float32(IN))
    weight = jax.random.uniform(k_w, (OUT, IN), minval=-bound, maxval=bound,
                                dtype=jnp.float32)
    bias = jax.random.uniform(k_b, (OUT,), minval=-bound, maxval=bound,
                              dtype=jnp.float32)

    # Init-time parameter prep (done once, outside the per-call path).
    w_t_padded = prepare_weight(weight)

    out = linear_add_relu(x, w_t_padded, bias, other)
    jax.block_until_ready(out)

    # Reference check in plain JAX.
    ref = jnp.maximum(x @ weight.T + bias + other, 0.0)
    assert out.shape == (B, OUT)
    assert jnp.allclose(out, ref, atol=1e-5, rtol=1e-5)

    print("KERNEL_OK")
</pallas_src>

<mosaic_0001>
module attributes {stable_mosaic.version = 11 : i64} {
  func.func @_linear_add_relu_kernel(%arg0: memref<8x16xf32, #tpu.memory_space<vmem>>, %arg1: memref<16x128xf32, #tpu.memory_space<vmem>>, %arg2: memref<1x128xf32, #tpu.memory_space<vmem>>, %arg3: memref<8x128xf32, #tpu.memory_space<vmem>>) attributes {dimension_semantics = [], scalar_prefetch = 0 : i64, scratch_operands = 0 : i64, tpu.core_type = #tpu.core_type<tc>} {
    %c0 = arith.constant 0 : index
    %c0_0 = arith.constant 0 : index
    %0 = vector.load %arg0[%c0, %c0_0] : memref<8x16xf32, #tpu.memory_space<vmem>>, vector<8x16xf32>
    %c0_1 = arith.constant 0 : index
    %c0_2 = arith.constant 0 : index
    %1 = vector.load %arg1[%c0_1, %c0_2] : memref<16x128xf32, #tpu.memory_space<vmem>>, vector<16x128xf32>
    %cst = arith.constant dense<0.000000e+00> : vector<8x128xf32>
    %2 = tpu.matmul %0, %1, %cst {dimension_numbers = #tpu.dot_dimension_numbers<[1], [0], [0], [1], [0, 0, 1, 1], [], []>} : vector<8x16xf32>, vector<16x128xf32>, vector<8x128xf32> -> vector<8x128xf32>
    %c0_3 = arith.constant 0 : index
    %c0_4 = arith.constant 0 : index
    %3 = vector.load %arg2[%c0_3, %c0_4] : memref<1x128xf32, #tpu.memory_space<vmem>>, vector<1x128xf32>
    %4 = vector.broadcast %3 : vector<1x128xf32> to vector<8x128xf32>
    %5 = arith.addf %2, %4 : vector<8x128xf32>
    %cst_5 = arith.constant 0.000000e+00 : f32
    %6 = vector.broadcast %cst_5 : f32 to vector<8x128xf32>
    %7 = arith.maximumf %5, %6 : vector<8x128xf32>
    %c0_6 = arith.constant 0 : index
    %c0_7 = arith.constant 0 : index
    %8 = vector.load %arg3[%c0_6, %c0_7] : memref<8x128xf32, #tpu.memory_space<vmem>>, vector<8x128xf32>
    tpu.vector_store %arg3[%c0_6, %c0_7], %7 {strides = array<i32>} : memref<8x128xf32, #tpu.memory_space<vmem>>, vector<8x128xf32>,
    return
  }
}

</mosaic_0001>

<bundles_post_ra>
// kernel: linear_add_relu.1
= control target key start
LH: loop header
LB: loop body
LE: loop exit
PB: predicated region body
PF: predicated region fallthrough
CT: control target
= control target key end

     0   :  { %vm21_vm0 = vcmask 130048   ;;  %s88_s1 = inlined_call_operand.vmem [shape: f32[16,128], index: 1, kind: input, shape index: {}]   ;;  %s89_s0 = inlined_call_operand.vmem [shape: f32[8,16], index: 0, kind: input, shape index: {}]   ;;  %s90_s2 = inlined_call_operand.vmem [shape: f32[1,128], index: 2, kind: input, shape index: {}]   ;;  %s91_s3 = inlined_call_operand.vmem [shape: f32[8,128], index: 3, kind: output, shape index: {}]  }
   0x1   :  { %v16_v0 = vld [vmem:[%s88_s1 + $0x8] sm:$0xff]  ;;  %v15_v1 = vld [vmem:[%s88_s1] sm:$0xff] }
   0x2   :  { %39 = vmatpush.msra.mxu0 %v16_v0  ;;  %v14_v2 = vld [vmem:[%s89_s0] sm:$0xff] }
   0x3   :  { %v52_v3 = vld [vmem:[%s90_s2] ss:$0 sm:$0xff] }
   0x4   :  { %40 = vmatpush.msra.mxu0 %v15_v1 }
   0x5   :  { %51 = vmatmul.msk.f32.vlgmr.msra.gmra.mxu0 %vm21_vm0, %v14_v2 }
  0x82   :  { %v42_v4 = vpop.f32.mrf.mxu0 }
  0x83   :  { %v43_v5 = vadd.f32 %v52_v3, %v42_v4 }
  0x85   :  { %v45_v6 = vmax.f32 %v43_v5, 0.0 }
  0x87   :  { %46 = vst [vmem:[%s91_s3] sm:$0xff] %v45_v6 }

</bundles_post_ra>
